<compile_context>
chip_gen: v7x
topology: tpu7x:2x2x1
jax: 0.10.0
libtpu: 0.0.40
codegen_flags: <defaults>
</compile_context>

<pallas_src>
import jax
import jax.numpy as jnp
from jax.experimental import pallas as pl
from jax.experimental.pallas import tpu as pltpu


def _round_up(n, m):
    return ((n + m - 1) // m) * m


def _my_linear_kernel(x_ref, w1_ref, w2_ref, t_ref, o_ref):
    """One (bm, L) row tile of the fused residual block.

    h   = relu((x @ (W1^T * s1)) + t1)
    y   = relu((h @ (W2^T * s2)) + t2)
    out = x + y
    """
    # bf16 MXU matmul #1, f32 accumulation.
    xb = x_ref[...].astype(jnp.bfloat16)
    h = jnp.dot(xb, w1_ref[...], preferred_element_type=jnp.float32)
    # f32 epilogue (shift + relu) — fast path on all generations (v5e has no bf16 VPU).
    h = jnp.maximum(h + t_ref[0:1, :], 0.0)

    # bf16 MXU matmul #2, f32 accumulation.
    y = jnp.dot(h.astype(jnp.bfloat16), w2_ref[...], preferred_element_type=jnp.float32)
    y = jnp.maximum(y + t_ref[1:2, :], 0.0)

    # Residual: re-read x at the point of use (no bm x L live range across the matmuls).
    o_ref[...] = (x_ref[...].astype(jnp.float32) + y).astype(o_ref.dtype)


def prepare_my_linear_params(params, *, eps=1e-5):
    """One-time (off the per-call path) folding of bias + eval-mode BN into the weights.

    Returns bf16 scale-folded transposed weights and a packed (2, L) f32 shift array.
    """
    s1 = params["g1"] / jnp.sqrt(params["v1"] + eps)
    t1 = (params["b1"] - params["m1"]) * s1 + params["be1"]
    s2 = params["g2"] / jnp.sqrt(params["v2"] + eps)
    t2 = (params["b2"] - params["m2"]) * s2 + params["be2"]

    w1t = (params["w1"].T * s1[None, :]).astype(jnp.bfloat16)  # (L, L): x @ w1t == bn-scaled x @ W1^T
    w2t = (params["w2"].T * s2[None, :]).astype(jnp.bfloat16)  # (L, L)
    t = jnp.stack([t1, t2]).astype(jnp.float32)                # (2, L): [t1; t2]
    return {"w1t": w1t, "w2t": w2t, "t": t}


def my_linear_forward(x, prep, *, block_m=512):
    """x: (N, L) float32 -> (N, L), matching torch MyLinear.forward in eval mode."""
    N, L = x.shape
    w1t, w2t, t = prep["w1t"], prep["w2t"], prep["t"]

    # Row tile: sublane-aligned, capped at block_m; ensure >= 2 tiles when N > 8 so
    # both v7x TensorCores get work under the "parallel" grid axis.
    bm = min(block_m, _round_up(N, 8))
    if N > 8:
        bm = min(bm, _round_up(pl.cdiv(N, 2), 8))
    grid = (pl.cdiv(N, bm),)  # ragged last block: masked output writes, rows independent

    cost = pl.CostEstimate(
        flops=2 * 2 * N * L * L,                              # two (N,L)x(L,L) matmuls
        transcendentals=0,
        bytes_accessed=2 * N * L * 4 + 2 * L * L * 2 + 2 * L * 4,  # x + out + bf16 weights + shifts
    )

    resident = dict(pipeline_mode=pl.Buffered(1))  # constant index_map -> single buffer

    return pl.pallas_call(
        _my_linear_kernel,
        out_shape=jax.ShapeDtypeStruct((N, L), x.dtype),
        grid_spec=pltpu.PrefetchScalarGridSpec(
            num_scalar_prefetch=0,
            grid=grid,
            in_specs=[
                pl.BlockSpec((bm, L), lambda i: (i, 0)),              # x row tile (f32)
                pl.BlockSpec((L, L), lambda i: (0, 0), **resident),   # W1^T * s1 (bf16, resident)
                pl.BlockSpec((L, L), lambda i: (0, 0), **resident),   # W2^T * s2 (bf16, resident)
                pl.BlockSpec((2, L), lambda i: (0, 0), **resident),   # packed shifts [t1; t2] (f32)
            ],
            out_specs=pl.BlockSpec((bm, L), lambda i: (i, 0)),
        ),
        compiler_params=pltpu.CompilerParams(
            dimension_semantics=("parallel",),
        ),
        cost_estimate=cost,
    )(x, w1t, w2t, t)


def _reference(x, p, eps=1e-5):
    """Pure-JAX f32 reference mirroring the torch module in eval mode."""
    hp = jax.lax.Precision.HIGHEST
    y = jnp.dot(x, p["w1"].T, precision=hp) + p["b1"]
    y = (y - p["m1"]) / jnp.sqrt(p["v1"] + eps) * p["g1"] + p["be1"]
    y = jnp.maximum(y, 0.0)
    y = jnp.dot(y, p["w2"].T, precision=hp) + p["b2"]
    y = (y - p["m2"]) / jnp.sqrt(p["v2"] + eps) * p["g2"] + p["be2"]
    y = jnp.maximum(y, 0.0)
    return x + y


if __name__ == "__main__":
    key = jax.random.PRNGKey(0)
    batch, linear_size = 16, 256
    keys = jax.random.split(key, 12)

    x = jax.random.normal(keys[0], (batch, linear_size), dtype=jnp.float32)
    params = {
        "w1": 0.03 * jax.random.normal(keys[1], (linear_size, linear_size), jnp.float32),
        "b1": 0.05 * jax.random.normal(keys[2], (linear_size,), jnp.float32),
        "g1": 1.0 + 0.1 * jax.random.normal(keys[3], (linear_size,), jnp.float32),
        "be1": 0.1 * jax.random.normal(keys[4], (linear_size,), jnp.float32),
        "m1": 0.1 * jax.random.normal(keys[5], (linear_size,), jnp.float32),
        "v1": jax.random.uniform(keys[6], (linear_size,), jnp.float32, 0.5, 1.5),
        "w2": 0.03 * jax.random.normal(keys[7], (linear_size, linear_size), jnp.float32),
        "b2": 0.05 * jax.random.normal(keys[8], (linear_size,), jnp.float32),
        "g2": 1.0 + 0.1 * jax.random.normal(keys[9], (linear_size,), jnp.float32),
        "be2": 0.1 * jax.random.normal(keys[10], (linear_size,), jnp.float32),
        "m2": 0.1 * jax.random.normal(keys[11], (linear_size,), jnp.float32),
        "v2": jax.random.uniform(keys[0], (linear_size,), jnp.float32, 0.5, 1.5),
    }

    # One-time parameter prep (transpose / BN folding / bf16 cast) — off the hot path.
    prep = jax.tree_util.tree_map(lambda a: a, prepare_my_linear_params(params))
    jax.block_until_ready(prep)

    out = my_linear_forward(x, prep)
    jax.block_until_ready(out)

    ref = _reference(x, params)
    assert out.shape == (batch, linear_size)
    assert jnp.allclose(out, ref, atol=2e-2, rtol=2e-2), (
        "mismatch vs reference: max abs err "
        f"{float(jnp.max(jnp.abs(out - ref))):.3e}"
    )

    print("KERNEL_OK")
</pallas_src>

<mosaic_0001>
module attributes {stable_mosaic.version = 11 : i64} {
  func.func @_my_linear_kernel(%arg0: i32, %arg1: memref<8x256xf32, #tpu.memory_space<vmem>>, %arg2: memref<256x256xbf16, #tpu.memory_space<vmem>>, %arg3: memref<256x256xbf16, #tpu.memory_space<vmem>>, %arg4: memref<2x256xf32, #tpu.memory_space<vmem>>, %arg5: memref<8x256xf32, #tpu.memory_space<vmem>>) attributes {dimension_semantics = [#tpu.dimension_semantics<parallel>], iteration_bounds = array<i64: 2>, scalar_prefetch = 0 : i64, scratch_operands = 0 : i64, tpu.core_type = #tpu.core_type<tc>, window_params = [{transform_indices = @transform_0, window_bounds = array<i64: 8, 256>}, {pipeline_mode = #tpu.pipeline_mode<synchronous>, transform_indices = @transform_1, window_bounds = array<i64: 256, 256>}, {pipeline_mode = #tpu.pipeline_mode<synchronous>, transform_indices = @transform_2, window_bounds = array<i64: 256, 256>}, {pipeline_mode = #tpu.pipeline_mode<synchronous>, transform_indices = @transform_3, window_bounds = array<i64: 2, 256>}, {transform_indices = @transform_4, window_bounds = array<i64: 8, 256>}]} {
    %c0 = arith.constant 0 : index
    %c0_0 = arith.constant 0 : index
    %0 = vector.load %arg1[%c0, %c0_0] : memref<8x256xf32, #tpu.memory_space<vmem>>, vector<8x256xf32>
    %1 = arith.truncf %0 : vector<8x256xf32> to vector<8x256xbf16>
    %c0_1 = arith.constant 0 : index
    %c0_2 = arith.constant 0 : index
    %2 = vector.load %arg2[%c0_1, %c0_2] : memref<256x256xbf16, #tpu.memory_space<vmem>>, vector<256x256xbf16>
    %cst = arith.constant dense<0.000000e+00> : vector<8x256xf32>
    %3 = tpu.matmul %1, %2, %cst {dimension_numbers = #tpu.dot_dimension_numbers<[1], [0], [0], [1], [0, 0, 1, 1], [], []>} : vector<8x256xbf16>, vector<256x256xbf16>, vector<8x256xf32> -> vector<8x256xf32>
    %c0_3 = arith.constant 0 : index
    %c0_4 = arith.constant 0 : index
    %4 = vector.load %arg4[%c0_3, %c0_4] : memref<2x256xf32, #tpu.memory_space<vmem>>, vector<1x256xf32>
    %5 = vector.broadcast %4 : vector<1x256xf32> to vector<8x256xf32>
    %6 = arith.addf %3, %5 : vector<8x256xf32>
    %cst_5 = arith.constant 0.000000e+00 : f32
    %7 = vector.broadcast %cst_5 : f32 to vector<8x256xf32>
    %8 = arith.maximumf %6, %7 : vector<8x256xf32>
    %9 = arith.truncf %8 : vector<8x256xf32> to vector<8x256xbf16>
    %c0_6 = arith.constant 0 : index
    %c0_7 = arith.constant 0 : index
    %10 = vector.load %arg3[%c0_6, %c0_7] : memref<256x256xbf16, #tpu.memory_space<vmem>>, vector<256x256xbf16>
    %cst_8 = arith.constant dense<0.000000e+00> : vector<8x256xf32>
    %11 = tpu.matmul %9, %10, %cst_8 {dimension_numbers = #tpu.dot_dimension_numbers<[1], [0], [0], [1], [0, 0, 1, 1], [], []>} : vector<8x256xbf16>, vector<256x256xbf16>, vector<8x256xf32> -> vector<8x256xf32>
    %c1 = arith.constant 1 : index
    %c0_9 = arith.constant 0 : index
    %12 = vector.load %arg4[%c1, %c0_9] : memref<2x256xf32, #tpu.memory_space<vmem>>, vector<1x256xf32>
    %13 = vector.broadcast %12 : vector<1x256xf32> to vector<8x256xf32>
    %14 = arith.addf %11, %13 : vector<8x256xf32>
    %cst_10 = arith.constant 0.000000e+00 : f32
    %15 = vector.broadcast %cst_10 : f32 to vector<8x256xf32>
    %16 = arith.maximumf %14, %15 : vector<8x256xf32>
    %c0_11 = arith.constant 0 : index
    %c0_12 = arith.constant 0 : index
    %17 = vector.load %arg1[%c0_11, %c0_12] : memref<8x256xf32, #tpu.memory_space<vmem>>, vector<8x256xf32>
    %18 = arith.addf %17, %16 : vector<8x256xf32>
    %c0_13 = arith.constant 0 : index
    %c0_14 = arith.constant 0 : index
    %19 = vector.load %arg5[%c0_13, %c0_14] : memref<8x256xf32, #tpu.memory_space<vmem>>, vector<8x256xf32>
    tpu.vector_store %arg5[%c0_13, %c0_14], %18 {strides = array<i32>} : memref<8x256xf32, #tpu.memory_space<vmem>>, vector<8x256xf32>,
    return
  }
  func.func @transform_0(%arg0: i32) -> (i32, i32) {
    %c0_i32 = arith.constant 0 : i32
    %c0_i32_0 = arith.constant 0 : i32
    return %arg0, %c0_i32 : i32, i32
  }
  func.func @transform_1(%arg0: i32) -> (i32, i32) {
    %c0_i32 = arith.constant 0 : i32
    %c0_i32_0 = arith.constant 0 : i32
    %c0_i32_1 = arith.constant 0 : i32
    return %c0_i32, %c0_i32_0 : i32, i32
  }
  func.func @transform_2(%arg0: i32) -> (i32, i32) {
    %c0_i32 = arith.constant 0 : i32
    %c0_i32_0 = arith.constant 0 : i32
    %c0_i32_1 = arith.constant 0 : i32
    return %c0_i32, %c0_i32_0 : i32, i32
  }
  func.func @transform_3(%arg0: i32) -> (i32, i32) {
    %c0_i32 = arith.constant 0 : i32
    %c0_i32_0 = arith.constant 0 : i32
    %c0_i32_1 = arith.constant 0 : i32
    return %c0_i32, %c0_i32_0 : i32, i32
  }
  func.func @transform_4(%arg0: i32) -> (i32, i32) {
    %c0_i32 = arith.constant 0 : i32
    %c0_i32_0 = arith.constant 0 : i32
    return %arg0, %c0_i32 : i32, i32
  }
}

</mosaic_0001>

<bundles_post_ra>
// kernel: tpu_custom_call.1
= control target key start
LH: loop header
LB: loop body
LE: loop exit
PB: predicated region body
PF: predicated region fallthrough
CT: control target
= control target key end

     0   :  { %9 = vsyncpa [#allocation3], 0  ;;  %s1544_s0 = inlined_call_operand.hbm [shape: f32[16,256], index: 0, kind: input, shape index: {}]   ;;  %s1545_s1 = inlined_call_operand.hbm [shape: bf16[256,256], index: 1, kind: input, shape index: {}]   ;;  %s1546_s2 = inlined_call_operand.hbm [shape: bf16[256,256], index: 2, kind: input, shape index: {}]   ;;  %s1547_s3 = inlined_call_operand.vmem [shape: f32[2,256], index: 3, kind: input, shape index: {}]   ;;  %s1548_s4 = inlined_call_operand.hbm [shape: f32[16,256], index: 4, kind: output, shape index: {}]  }
   0x1   :  { %11 = vsyncpa [#allocation3 + $0x1], 0 }
   0x2   :  { %12 = vsyncpa [#allocation6], 0 }
   0x3   :  { %13 = vsyncpa [#allocation4], 0 }
   0x4   :  { %15 = vsyncpa [#allocation4 + $0x1], 0  ;;  %s1291_s15 = smov 0   ;;  %s1293_s16 = smov 0  }
   0x5   :  { %s1295_s17 = smov 0   ;;  %s1297_s18 = smov 0  }
   0x6 LB: > { %s1312_s19 = sadd.s32 4294967295, %s1258_s18   ;;  %s852_s20 = sadd.s32 4294967294, %s1258_s18   ;;  %s1258_s18 = sphi %s1297_s18, %s1568_s18   ;;  %s1254_s17 = sphi %s1295_s17, %s1567_s17   ;;  %s1250_s16 = sphi %s1293_s16, %s1566_s16   ;;  %s1246_s15 = sphi %s1291_s15, %s1565_s15  }
   0x7   : > { %p41_p0 = scmp.ne.s32.totalorder %s1250_s16, %s1246_s15  ;;  %p1549_p1 = scmp.eq.s32.totalorder %s1312_s19, 0 }
   0x8   : > { %p134_p3 = scmp.eq.s32.totalorder %s852_s20, 1  ;;  %p853_p5 = scmp.ge.s32.totalorder %s1258_s18, 1 }
   0x9   : > { %p1321_p4 = por %p1549_p1, %p41_p0  ;;  %p141_p7 = scmp.lt.s32.totalorder %s1258_s18, 3 }
   0xa   : > { %p1326_p6 = por %p134_p3, %p41_p0  ;;  %s1260_s24 = smov [#allocation5]  }
   0xb   : > { %s1552_s21 = scalar_select %p1321_p4, 1, 0 }
   0xc   : > { %s1553_s22 = scalar_select %p1326_p6, 1, 0 }
   0xd   : > { %p1331_p8 = pnand %p853_p5, %p141_p7  ;;  %s153_s25 = sshll.u32 %s1260_s24, 4  ;;  %s1335_s25 = int_to_ptr.vmem [resolvable:$true] %s153_s25 }
   0xe   : > { %s1261_s27 = smov [#allocation7]   ;;  %s1102_s5 = scalar_lea.hbm %s1545_s1, 4096 }
   0xf   : > { %p949_p9 = pneg %p1331_p8  ;;  %s166_s28 = sshll.u32 %s1261_s27, 4  ;;  %s1346_s28 = int_to_ptr.vmem [resolvable:$true] %s166_s28 }
  0x10   : > { %p1103_p12 = scmp.ne.s32.totalorder %s1545_s1, %s1102_s5  ;;  %p1109_p5 = scmp.lt.u32.totalorder %s1102_s5, %s1545_s1 }
  0x11   : > { %p1342_p11 = pnand %p949_p9, %p1549_p1 }
  0x13   : > { %p1104_p13 = pneg %p1342_p11 }
  0x15   : > { %p1105_p0 = pnand %p1104_p13, %p1103_p12 }
  0x17   : > { %p1106_p3 = pneg %p1105_p0 }
  0x19   : > { %p1111_p7 = pnand %p1109_p5, %p1106_p3 }
  0x1b   : > { %1114 = shalt.err (!%p1111_p7)
}
  0x1c   : > { %s1115_s10 = scalar_lea.vmem %s1335_s25, 4096  ;;  %p1123_p2 = scmp.lt.s32.totalorder %s1335_s25, %s1335_s25 }
  0x1d   : > { %p1116_p9 = scmp.ne.s32.totalorder %s1335_s25, %s1115_s10  ;;  %p1124_p12 = scmp.lt.s32.totalorder %s1115_s10, %s1115_s10 }
  0x1f   : > { %p1118_p10 = pnand %p1116_p9, %p1104_p13  ;;  %p1125_p0 = por %p1124_p12, %p1123_p2 }
  0x21   : > { %p1119_p1 = pneg %p1118_p10 }
  0x23   : > { %p1126_p6 = pnand %p1125_p0, %p1119_p1 }
  0x25   : > { %1129 = shalt.err (!%p1126_p6)
}
  0x26   : > { %s1262_s11 = smov 128   ;;  %s1263_s12 = smov 8  }
  0x27   : > { %952 = dma.hbm_to_vmem [thread:$0]  (!%p1342_p11), %s1545_s1, 4096, %s1335_s25, [#allocation6], %s1262_s11, %s1262_s11, %s1263_s12  }
  0x28   : > { %s1130_s27 = scalar_lea.hbm %s1546_s2, 4096 }
  0x29   : > { %p1131_p2 = scmp.ne.s32.totalorder %s1546_s2, %s1130_s27  ;;  %p1137_p10 = scmp.lt.u32.totalorder %s1130_s27, %s1546_s2 }
  0x2b   : > { %p1133_p1 = pnand %p1131_p2, %p1104_p13 }
  0x2d   : > { %p1134_p6 = pneg %p1133_p1 }
  0x2f   : > { %p1139_p3 = pnand %p1137_p10, %p1134_p6 }
  0x31   : > { %1142 = shalt.err (!%p1139_p3)
}
  0x32   : > { %s1143_s25 = scalar_lea.vmem %s1346_s28, 4096  ;;  %p1151_p12 = scmp.lt.s32.totalorder %s1346_s28, %s1346_s28 }
  0x33   : > { %p1144_p5 = scmp.ne.s32.totalorder %s1346_s28, %s1143_s25  ;;  %p1152_p0 = scmp.lt.s32.totalorder %s1143_s25, %s1143_s25 }
  0x35   : > { %p1146_p7 = pnand %p1144_p5, %p1104_p13  ;;  %p1153_p2 = por %p1152_p0, %p1151_p12 }
  0x37   : > { %p1147_p9 = pneg %p1146_p7 }
  0x39   : > { %p1154_p1 = pnand %p1153_p2, %p1147_p9 }
  0x3b   : > { %1157 = shalt.err (!%p1154_p1)
}
  0x3c   : > { %955 = dma.hbm_to_vmem [thread:$0]  (!%p1342_p11), %s1546_s2, 4096, %s1346_s28, [#allocation6], %s1262_s11, %s1262_s11, %s1263_s12  }
  0x3d   : > { %s1401_s9 = sadd.s32 1, %s1258_s18   ;;  %s28_s26 = sadd.s32 1, %s1254_s17 }
  0x3e   : > { %s25_s10 = ssub.s32 %s1258_s18, %s1401_s9  ;;  %p35_p13 = scmp.ne.s32.totalorder %s1254_s17, %s1250_s16 }
  0x3f   : > { %p26_p6 = scmp.eq.s32.totalorder %s25_s10, 0  ;;  %p36_p10 = scmp.eq.s32.totalorder %s1258_s18, 0 }
  0x40   : > { %p1556_p3 = scmp.eq.s32.totalorder %s1312_s19, 1  ;;  %p966_p7 = scmp.lt.s32.totalorder %s1258_s18, 2 }
  0x41   : > { %s1417_s14 = scalar_select %p26_p6, %s1254_s17, %s28_s26  }
  0x42   : > { %p1411_p5 = por %p1556_p3, %p35_p13  ;;  %p37_p9 = por %p36_p10, %p35_p13 }
  0x43   : > { %s183_s20 = sand.u32 1, %s1254_s17   ;;  %s935_s28 = sshll.u32 %s1258_s18, 8 }
  0x44   : > { %s1557_s13 = scalar_select %p1411_p5, 1, 0 }
  0x45   : > { %s857_s24 = sshll.u32 %s183_s20, 4  ;;  %s1424_s27 = scalar_lea.hbm %s1544_s0, %s935_s28 }
  0x46   : > { %s187_s29 = scalar_lea.vmem [#allocation2], %s857_s24  ;;  %p1428_p11 = pnand %p966_p7, %p37_p9 }
  0x47   : > { %s195_s30 = sshll.u32 %s187_s29, 4  ;;  %s184_s6 = scalar_lea.sflag [#allocation3], %s183_s20  ;;  %s1426_s30 = int_to_ptr.vmem [resolvable:$true] %s195_s30 }
  0x48   : > { %s1158_s25 = scalar_lea.hbm %s1424_s27, 256  ;;  %p1160_p0 = pneg %p1428_p11 }
  0x49   : > { %p1159_p12 = scmp.ne.s32.totalorder %s1424_s27, %s1158_s25  ;;  %s1163_s26 = scalar_lea.hbm %s1544_s0, 512 }
  0x4a   : > { %p1164_p13 = scmp.lt.u32.totalorder %s1424_s27, %s1544_s0  ;;  %p1165_p6 = scmp.lt.u32.totalorder %s1163_s26, %s1158_s25 }
  0x4b   : > { %p1161_p2 = pnand %p1160_p0, %p1159_p12  ;;  %p1167_p3 = scmp.lt.u32.totalorder %s1158_s25, %s1424_s27 }
  0x4c   : > { %p1166_p10 = por %p1165_p6, %p1164_p13 }
  0x4d   : > { %p1162_p1 = pneg %p1161_p2 }
  0x4e   : > { %p1168_p7 = por %p1167_p3, %p1166_p10 }
  0x50   : > { %p1169_p9 = pnand %p1168_p7, %p1162_p1 }
  0x52   : > { %1172 = shalt.err (!%p1169_p9)
}
  0x53   : > { %s1173_s20 = scalar_lea.vmem %s1426_s30, 256  ;;  %s1264_s28 = smov [#allocation2]  }
  0x54   : > { %p1174_p12 = scmp.ne.s32.totalorder %s1426_s30, %s1173_s20  ;;  %s1178_s11 = sshll.u32 %s1264_s28, 4  ;;  %s1179_s11 = int_to_ptr.vmem [resolvable:$false] %s1178_s11 }
  0x55   : > { %s1180_s12 = scalar_lea.vmem %s1179_s11, 512  ;;  %p1181_p4 = scmp.lt.s32.totalorder %s1426_s30, %s1179_s11 }
  0x56   : > { %p1176_p2 = pnand %p1174_p12, %p1160_p0  ;;  %p1182_p13 = scmp.lt.s32.totalorder %s1180_s12, %s1173_s20 }
  0x58   : > { %p1177_p5 = pneg %p1176_p2  ;;  %p1183_p6 = por %p1182_p13, %p1181_p4 }
  0x5a   : > { %p1184_p10 = pnand %p1183_p6, %p1177_p5 }
  0x5c   : > { %1187 = shalt.err (!%p1184_p10)
}
  0x5d   : > { %959 = dma.hbm_to_vmem [thread:$0]  (!%p1428_p11), %s1424_s27, 256, %s1426_s30, %s184_s6  }
  0x5e   : > { %204 = sbr.rel (%p1331_p8) target bundleno = 623 (0x26f), region = 36  ;;  %s1460_s29 = sand.u32 (!%p1331_p8), 1, %s1250_s16  }
  0x5f   : > { %s861_s25 = sshll.u32 (!%p1331_p8), %s1460_s29, 4  ;;  %s207_s7 = scalar_lea.sflag (!%p1331_p8), [#allocation3], %s1460_s29 }
  0x60   : > { %s1466_s8 = scalar_lea.vmem (!%p1331_p8), [#allocation2], %s861_s25  ;;  %p1559_p4 = scmp.ne.s32.totalorder (!%p1331_p8), %s1552_s21, 0 }
  0x65   : > { %1233 = dma.done.wait (%p1559_p4), %s207_s7, 256  }
  0x66   : > { %1235 = vsyncadd (%p1559_p4), %s207_s7, 4294967040  ;;  %p1560_p5 = scmp.eq.s32.totalorder %s1312_s19, 0 }
  0x68   : > { %1237 = dma.done.wait (%p1560_p5), [#allocation6], 8192   ;;  %p1561_p8 = pmov %p1560_p5 }
  0x69   : > { %v1006_v0 = vld [vmem:[#allocation5 + $0x4] ss:$8 sps:$4 sm:$0xff]   ;;  %v1008_v1 = vld [vmem:[#allocation5] ss:$8 sps:$4 sm:$0xff]   ;;  %v1009_v2 = vld [vmem:[#allocation5 + $0x14] ss:$8 sps:$4 sm:$0xff]  }
  0x6a   : > { %1239 = vsyncadd (%p1561_p8), [#allocation6], 4294959104  ;;  %451 = vmatprep.subr.bf16.mxu0 %v1006_v0  ;;  %v1011_v3 = vld [vmem:[#allocation5 + $0x10] ss:$8 sps:$4 sm:$0xff]   ;;  %v1012_v4 = vld [vmem:[#allocation5 + $0x24] ss:$8 sps:$4 sm:$0xff]  }
  0x6b   : > { %452 = vmatpush1.bf16.msra.mxu0 %v1008_v1  ;;  %v1014_v5 = vld [vmem:[#allocation5 + $0x20] ss:$8 sps:$4 sm:$0xff]   ;;  %v1015_v6 = vld [vmem:[#allocation5 + $0x34] ss:$8 sps:$4 sm:$0xff]   ;;  %v1017_v7 = vld [vmem:[#allocation5 + $0x30] ss:$8 sps:$4 sm:$0xff]  }
  0x6c   : > { %453 = vmatprep.subr.bf16.mxu0 %v1009_v2  ;;  %v1018_v8 = vld [vmem:[#allocation5 + $0x44] ss:$8 sps:$4 sm:$0xff]   ;;  %v1020_v9 = vld [vmem:[#allocation5 + $0x40] ss:$8 sps:$4 sm:$0xff]   ;;  %v1021_v10 = vld [vmem:[#allocation5 + $0x54] ss:$8 sps:$4 sm:$0xff]  }
  0x6d   : > { %v1023_v11 = vld [vmem:[#allocation5 + $0x50] ss:$8 sps:$4 sm:$0xff]   ;;  %v1024_v12 = vld [vmem:[#allocation5 + $0x64] ss:$8 sps:$4 sm:$0xff]   ;;  %v1026_v13 = vld [vmem:[#allocation5 + $0x60] ss:$8 sps:$4 sm:$0xff]  }
  0x6e   : > { %v1477_v14 = vld [vmem:[%s1466_s8 + $0x8] sm:$0xff]  ;;  %v1482_v54 = vld [vmem:[%s1466_s8] sm:$0xff]  ;;  %s936_s5 = sshll.u32 %s1312_s19, 8  ;;  %s242_s6 = scalar_lea.vmem [#allocation8], %s861_s25 }
  0x6f   : > { %454 = vmatpush1.bf16.msra.mxu0 %v1011_v3  ;;  %v246_v15 = vpack.c.bf16 %v1477_v14, %v1477_v14  ;;  %v1054_v16 = vld [vmem:[#allocation7 + $0x4] ss:$8 sps:$4 sm:$0xff]   ;;  %v1056_v17 = vld [vmem:[#allocation7] ss:$8 sps:$4 sm:$0xff]   ;;  %v1027_v18 = vld [vmem:[#allocation5 + $0x74] ss:$8 sps:$4 sm:$0xff]   ;;  %v245_v56 = vpack.c.bf16 %v1482_v54, %v1482_v54  ;;  %s1500_s20 = scalar_lea.hbm %s1548_s4, %s936_s5 }
  0x70   : > { %455 = vmatprep.subr.bf16.mxu0 %v1012_v4  ;;  %v1057_v19 = vld [vmem:[#allocation7 + $0x14] ss:$8 sps:$4 sm:$0xff]   ;;  %v1029_v20 = vld [vmem:[#allocation5 + $0x70] ss:$8 sps:$4 sm:$0xff]   ;;  %701 = vmatprep.subr.bf16.mxu1 %v1054_v16  ;;  %v1060_v22 = vld [vmem:[#allocation7 + $0x24] ss:$8 sps:$4 sm:$0xff]   ;;  %v281_v4 = vlaneseq }
  0x71   : > { %483 = vmatprep.mubr.bf16.mxu0 %v246_v15  ;;  %702 = vmatpush1.bf16.msra.mxu1 %v1056_v17  ;;  %v1059_v21 = vld [vmem:[#allocation7 + $0x10] ss:$8 sps:$4 sm:$0xff]   ;;  %v1030_v23 = vld [vmem:[#allocation5 + $0x84] ss:$8 sps:$4 sm:$0xff]   ;;  %v1032_v24 = vld [vmem:[#allocation5 + $0x80] ss:$8 sps:$4 sm:$0xff]  }
  0x72   : > { %703 = vmatprep.subr.bf16.mxu1 %v1057_v19  ;;  %v1062_v25 = vld [vmem:[#allocation7 + $0x20] ss:$8 sps:$4 sm:$0xff]   ;;  %v1063_v26 = vld [vmem:[#allocation7 + $0x34] ss:$8 sps:$4 sm:$0xff]   ;;  %v1035_v28 = vld [vmem:[#allocation5 + $0x90] ss:$8 sps:$4 sm:$0xff]  }
  0x73   : > { %456 = vmatpush1.bf16.msra.mxu0 %v1014_v5  ;;  %v1033_v27 = vld [vmem:[#allocation5 + $0x94] ss:$8 sps:$4 sm:$0xff]   ;;  %v1065_v29 = vld [vmem:[#allocation7 + $0x30] ss:$8 sps:$4 sm:$0xff]   ;;  %v1066_v30 = vld [vmem:[#allocation7 + $0x44] ss:$8 sps:$4 sm:$0xff]  }
  0x74   : > { %457 = vmatprep.subr.bf16.mxu0 %v1015_v6  ;;  %v1036_v31 = vld [vmem:[#allocation5 + $0xa4] ss:$8 sps:$4 sm:$0xff]   ;;  %v1038_v32 = vld [vmem:[#allocation5 + $0xa0] ss:$8 sps:$4 sm:$0xff]   ;;  %v1069_v34 = vld [vmem:[#allocation7 + $0x54] ss:$8 sps:$4 sm:$0xff]  }
  0x75   : > { %704 = vmatpush1.bf16.msra.mxu1 %v1059_v21  ;;  %v1068_v33 = vld [vmem:[#allocation7 + $0x40] ss:$8 sps:$4 sm:$0xff]   ;;  %v1039_v35 = vld [vmem:[#allocation5 + $0xb4] ss:$8 sps:$4 sm:$0xff]   ;;  %v1071_v36 = vld [vmem:[#allocation7 + $0x50] ss:$8 sps:$4 sm:$0xff]  }
  0x76   : > { %705 = vmatprep.subr.bf16.mxu1 %v1060_v22  ;;  %v1041_v37 = vld [vmem:[#allocation5 + $0xb0] ss:$8 sps:$4 sm:$0xff]   ;;  %v1072_v38 = vld [vmem:[#allocation7 + $0x64] ss:$8 sps:$4 sm:$0xff]   ;;  %v1074_v40 = vld [vmem:[#allocation7 + $0x60] ss:$8 sps:$4 sm:$0xff]  }
  0x77   : > { %458 = vmatpush1.bf16.msra.mxu0 %v1017_v7  ;;  %v1042_v39 = vld [vmem:[#allocation5 + $0xc4] ss:$8 sps:$4 sm:$0xff]   ;;  %v1044_v41 = vld [vmem:[#allocation5 + $0xc0] ss:$8 sps:$4 sm:$0xff]   ;;  %v1075_v42 = vld [vmem:[#allocation7 + $0x74] ss:$8 sps:$4 sm:$0xff]  }
  0x78   : > { %459 = vmatprep.subr.bf16.mxu0 %v1018_v8  ;;  %v1045_v43 = vld [vmem:[#allocation5 + $0xd4] ss:$8 sps:$4 sm:$0xff]   ;;  %v1077_v44 = vld [vmem:[#allocation7 + $0x70] ss:$8 sps:$4 sm:$0xff]   ;;  %v1078_v46 = vld [vmem:[#allocation7 + $0x84] ss:$8 sps:$4 sm:$0xff]  }
  0x79   : > { %706 = vmatpush1.bf16.msra.mxu1 %v1062_v25  ;;  %v1047_v45 = vld [vmem:[#allocation5 + $0xd0] ss:$8 sps:$4 sm:$0xff]   ;;  %v1048_v47 = vld [vmem:[#allocation5 + $0xe4] ss:$8 sps:$4 sm:$0xff]   ;;  %v1080_v48 = vld [vmem:[#allocation7 + $0x80] ss:$8 sps:$4 sm:$0xff]  }
  0x7a   : > { %707 = vmatprep.subr.bf16.mxu1 %v1063_v26  ;;  %v1050_v49 = vld [vmem:[#allocation5 + $0xe0] ss:$8 sps:$4 sm:$0xff]   ;;  %v1081_v50 = vld [vmem:[#allocation7 + $0x94] ss:$8 sps:$4 sm:$0xff]   ;;  %v1083_v52 = vld [vmem:[#allocation7 + $0x90] ss:$8 sps:$4 sm:$0xff]  }
  0x7b   : > { %460 = vmatpush1.bf16.msra.mxu0 %v1020_v9  ;;  %v1051_v51 = vld [vmem:[#allocation5 + $0xf4] ss:$8 sps:$4 sm:$0xff]   ;;  %v1053_v53 = vld [vmem:[#allocation5 + $0xf0] ss:$8 sps:$4 sm:$0xff]   ;;  %v1084_v55 = vld [vmem:[#allocation7 + $0xa4] ss:$8 sps:$4 sm:$0xff]  }
  0x7c   : > { %461 = vmatprep.subr.bf16.mxu0 %v1021_v10  ;;  %v1086_v57 = vld [vmem:[#allocation7 + $0xa0] ss:$8 sps:$4 sm:$0xff]   ;;  %v1087_v58 = vld [vmem:[#allocation7 + $0xb4] ss:$8 sps:$4 sm:$0xff]   ;;  %v1089_v59 = vld [vmem:[#allocation7 + $0xb0] ss:$8 sps:$4 sm:$0xff]  }
  0x7d   : > { %708 = vmatpush1.bf16.msra.mxu1 %v1065_v29  ;;  %v1090_v60 = vld [vmem:[#allocation7 + $0xc4] ss:$8 sps:$4 sm:$0xff]   ;;  %v1092_v61 = vld [vmem:[#allocation7 + $0xc0] ss:$8 sps:$4 sm:$0xff]   ;;  %v1093_v62 = vld [vmem:[#allocation7 + $0xd4] ss:$8 sps:$4 sm:$0xff]  }
  0x7e   : > { %709 = vmatprep.subr.bf16.mxu1 %v1066_v30  ;;  %v1095_v63 = vld [vmem:[#allocation7 + $0xd0] ss:$8 sps:$4 sm:$0xff]   ;;  %v1096_v0 = vld [vmem:[#allocation7 + $0xe4] ss:$8 sps:$4 sm:$0xff]   ;;  %v1098_v1 = vld [vmem:[#allocation7 + $0xe0] ss:$8 sps:$4 sm:$0xff]  }
  0x7f   : > { %462 = vmatpush1.bf16.msra.mxu0 %v1023_v11  ;;  %v1099_v2 = vld [vmem:[#allocation7 + $0xf4] ss:$8 sps:$4 sm:$0xff]   ;;  %v1101_v3 = vld [vmem:[#allocation7 + $0xf0] ss:$8 sps:$4 sm:$0xff]   ;;  %v282_v5 = vshrl.u32 %v281_v4, 7  ;;  %s763_s26 = sshll.u32 %s242_s6, 4  ;;  %s1502_s26 = int_to_ptr.vmem [resolvable:$true] %s763_s26 }
  0x80   : > { %463 = vmatprep.subr.bf16.mxu0 %v1024_v12  ;;  %v279_v7 = vld [vmem:[%s1547_s3] ss:$2 sm:$0x3]  ;;  %v897_v22 = vld [vmem:[%s1547_s3 + $0x1] ss:$2 sm:$0x3] }
  0x81   : > { %710 = vmatpush1.bf16.msra.mxu1 %v1068_v33  ;;  %v283_v6 = vsub.s32 0, %v282_v5  ;;  %v287_v8 = vsub.s32 1, %v282_v5  ;;  %s749_s19 = scalar_lea.sflag [#allocation4], %s1460_s29  ;;  %s1188_s28 = scalar_lea.vmem %s1502_s26, 256 }
  0x82   : > { %711 = vmatprep.subr.bf16.mxu1 %v1069_v34  ;;  %p1189_p11 = scmp.ne.s32.totalorder %s1502_s26, %s1188_s28  ;;  %p1562_p0 = scmp.ne.s32.totalorder %s1557_s13, 0 }
  0x83   : > { %464 = vmatpush1.bf16.msra.mxu0 %v1026_v13  ;;  %v284_v9 = vrot.slane %v279_v7, %v283_v6  ;;  %v288_v10 = vrot.slane %v279_v7, %v287_v8  ;;  %s1265_s11 = smov [#allocation8]  }
  0x84   : > { %465 = vmatprep.subr.bf16.mxu0 %v1027_v18  ;;  %p1190_p1 = pnand %p1189_p11, %p1562_p0  ;;  %s1192_s12 = sshll.u32 %s1265_s11, 4  ;;  %s1193_s12 = int_to_ptr.vmem [resolvable:$false] %s1192_s12 }
  0x85   : > { %712 = vmatpush1.bf16.msra.mxu1 %v1071_v36  ;;  %s1194_s25 = scalar_lea.vmem %s1193_s12, 512  ;;  %p1195_p7 = scmp.lt.s32.totalorder %s1502_s26, %s1193_s12 }
  0x86   : > { %713 = vmatprep.subr.bf16.mxu1 %v1072_v38  ;;  %p1191_p3 = pneg %p1190_p1  ;;  %p1196_p9 = scmp.lt.s32.totalorder %s1194_s25, %s1188_s28 }
  0x87   : > { %466 = vmatpush1.bf16.msra.mxu0 %v1029_v20 }
  0x88   : > { %467 = vmatprep.subr.bf16.mxu0 %v1030_v23  ;;  %v534_v23 = vrot.slane %v897_v22, %v283_v6  ;;  %p1197_p12 = por %p1196_p9, %p1195_p7 }
  0x89   : > { %714 = vmatpush1.bf16.msra.mxu1 %v1074_v40 }
  0x8a   : > { %715 = vmatprep.subr.bf16.mxu1 %v1075_v42  ;;  %p1198_p2 = pnand %p1197_p12, %p1191_p3 }
  0x8b   : > { %468 = vmatpush1.bf16.msra.mxu0 %v1032_v24  ;;  %v538_v24 = vrot.slane %v897_v22, %v287_v8 }
  0x8c   : > { %469 = vmatprep.subr.bf16.mxu0 %v1033_v27 }
  0x8d   : > { %716 = vmatpush1.bf16.msra.mxu1 %v1077_v44 }
  0x8e   : > { %717 = vmatprep.subr.bf16.mxu1 %v1078_v46 }
  0x8f   : > { %470 = vmatpush1.bf16.msra.mxu0 %v1035_v28 }
  0x90   : > { %471 = vmatprep.subr.bf16.mxu0 %v1036_v31 }
  0x91   : > { %718 = vmatpush1.bf16.msra.mxu1 %v1080_v48 }
  0x92   : > { %719 = vmatprep.subr.bf16.mxu1 %v1081_v50 }
  0x93   : > { %472 = vmatpush1.bf16.msra.mxu0 %v1038_v32 }
  0x94   : > { %473 = vmatprep.subr.bf16.mxu0 %v1039_v35 }
  0x95   : > { %720 = vmatpush1.bf16.msra.mxu1 %v1083_v52 }
  0x96   : > { %721 = vmatprep.subr.bf16.mxu1 %v1084_v55 }
  0x97   : > { %474 = vmatpush1.bf16.msra.mxu0 %v1041_v37 }
  0x98   : > { %475 = vmatprep.subr.bf16.mxu0 %v1042_v39 }
  0x99   : > { %722 = vmatpush1.bf16.msra.mxu1 %v1086_v57 }
  0x9a   : > { %723 = vmatprep.subr.bf16.mxu1 %v1087_v58 }
  0x9b   : > { %476 = vmatpush1.bf16.msra.mxu0 %v1044_v41 }
  0x9c   : > { %477 = vmatprep.subr.bf16.mxu0 %v1045_v43 }
  0x9d   : > { %724 = vmatpush1.bf16.msra.mxu1 %v1089_v59 }
  0x9e   : > { %725 = vmatprep.subr.bf16.mxu1 %v1090_v60 }
  0x9f   : > { %478 = vmatpush1.bf16.msra.mxu0 %v1047_v45 }
  0xa0   : > { %479 = vmatprep.subr.bf16.mxu0 %v1048_v47 }
  0xa1   : > { %726 = vmatpush1.bf16.msra.mxu1 %v1092_v61 }
  0xa2   : > { %727 = vmatprep.subr.bf16.mxu1 %v1093_v62 }
  0xa3   : > { %480 = vmatpush1.bf16.msra.mxu0 %v1050_v49 }
  0xa4   : > { %481 = vmatprep.subr.bf16.mxu0 %v1051_v51 }
  0xa5   : > { %728 = vmatpush1.bf16.msra.mxu1 %v1095_v63 }
  0xa6   : > { %729 = vmatprep.subr.bf16.mxu1 %v1096_v0 }
  0xa7   : > { %482 = vmatpush1.bf16.msra.mxu0 %v1053_v53 }
  0xa9   : > { %730 = vmatpush1.bf16.msra.mxu1 %v1098_v1 }
  0xaa   : > { %484 = vmatmul.mubr.bf16.vlgmr.msra.gmra.mrb[0].mxu0 %v245_v56  ;;  %731 = vmatprep.subr.bf16.mxu1 %v1099_v2 }
  0xad   : > { %732 = vmatpush1.bf16.msra.mxu1 %v1101_v3 }
 0x17d   : > { %v485_v11 = vpop.f32.mrb[0].mxu0 }
 0x17e   : > { %v486_v12 = vadd.f32 %v485_v11, %v284_v9  ;;  %v487_v13 = vpop.f32.mrb[1].mxu0 }
 0x17f   : > { %v488_v15 = vadd.f32 %v487_v13, %v288_v10  ;;  %v489_v16 = vpop.f32.mrb[2].mxu0 }
 0x180   : > { %v492_v17 = vmax.f32 %v486_v12, 0.0  ;;  %v490_v18 = vpop.f32.mrb[3].mxu0 }
 0x181   : > { %v493_v19 = vmax.f32 %v488_v15, 0.0 }
 0x182   : > { %v494_v21 = vpack.c.bf16 %v492_v17, %v492_v17 }
 0x183   : > { %v495_v20 = vpack.c.bf16 %v493_v19, %v493_v19 }
 0x185   : > { %733 = vmatprep.mubr.bf16.mxu1 %v495_v20 }
 0x186   : > { %734 = vmatmul.mubr.bf16.vlgmr.msra.gmra.mrb[0].mxu1 %v494_v21 }
 0x259   : > { %v735_v25 = vpop.f32.mrb[0].mxu1 }
 0x25a   : > { %v736_v26 = vadd.f32 %v735_v25, %v534_v23  ;;  %v737_v27 = vpop.f32.mrb[1].mxu1 }
 0x25b   : > { %v738_v28 = vadd.f32 %v737_v27, %v538_v24  ;;  %v739_v29 = vpop.f32.mrb[2].mxu1 }
 0x25c   : > { %v742_v30 = vmax.f32 %v736_v26, 0.0  ;;  %v740_v31 = vpop.f32.mrb[3].mxu1 }
 0x25d   : > { %v743_v32 = vmax.f32 %v738_v28, 0.0 }
 0x25e   : > { %v744_v33 = vadd.f32 %v742_v30, %v1482_v54 }
 0x25f   : > { %v745_v34 = vadd.f32 %v743_v32, %v1477_v14 }
 0x260   : > { %746 = vst [vmem:[%s242_s6] sm:$0xff] %v744_v33 }
 0x261   : > { %747 = vst [vmem:[%s242_s6 + $0x8] sm:$0xff] %v745_v34 }
 0x262   : > { %1201 = shalt.err (!%p1198_p2)
}
 0x263   : > { %s1202_s29 = scalar_lea.hbm %s1500_s20, 256  ;;  %s1206_s21 = scalar_lea.hbm %s1548_s4, 512 }
 0x264   : > { %p1203_p13 = scmp.ne.s32.totalorder %s1500_s20, %s1202_s29  ;;  %p1207_p4 = scmp.lt.u32.totalorder %s1500_s20, %s1548_s4 }
 0x265   : > { %p1208_p5 = scmp.lt.u32.totalorder %s1206_s21, %s1202_s29  ;;  %p1210_p11 = scmp.lt.u32.totalorder %s1202_s29, %s1500_s20 }
 0x266   : > { %p1204_p6 = pnand %p1203_p13, %p1562_p0 }
 0x267   : > { %p1209_p8 = por %p1208_p5, %p1207_p4 }
 0x268   : > { %p1205_p10 = pneg %p1204_p6 }
 0x269   : > { %p1211_p1 = por %p1210_p11, %p1209_p8 }
 0x26b   : > { %p1212_p3 = pnand %p1211_p1, %p1205_p10 }
 0x26d   : > { %1215 = shalt.err (!%p1212_p3)
}
 0x26e   : > { %947 = dma.vmem_to_hbm [thread:$0]  (%p1562_p0), %s1502_s26, 256, %s1500_s20, %s749_s19  }
 0x26f PF: > { %s775_s30 = sand.u32 1, %s1246_s15   ;;  %p1563_p7 = scmp.ne.s32.totalorder %s1553_s22, 0 }
 0x270   : > { %p1564_p9 = scmp.ge.s32.totalorder %s1258_s18, 2  ;;  %s776_s5 = scalar_lea.sflag [#allocation4], %s775_s30 }
 0x272   : > { %p961_p12 = pnand %p1564_p9, %p1563_p7 }
 0x274   : > { %1241 = dma.done.wait (!%p961_p12), %s776_s5, 256  }
 0x275   : > { %1243 = vsyncadd (!%p961_p12), %s776_s5, 4294967040  ;;  %p18_p2 = scmp.ge.s32.totalorder %s1401_s9, 4   ;;  %s1565_s15 = smov %s1250_s16 }
 0x276   : > { %s1566_s16 = smov %s1254_s17  ;;  %s1567_s17 = smov %s1417_s14 }
 0x277   : > { %s1568_s18 = smov %s1401_s9  ;;  %20 = sbr.rel (!%p18_p2) target bundleno = 6 (0x6), region = 90 }
 0x27e   :  { %781 = vsyncpa [#allocation3], 1 }
 0x27f   :  { %783 = vsyncpa [#allocation3 + $0x1], 1 }
 0x280   :  { %784 = vsyncpa [#allocation6], 1 }
 0x281   :  { %785 = vsyncpa [#allocation4], 1 }
 0x282   :  { %787 = vsyncpa [#allocation4 + $0x1], 1 }

</bundles_post_ra>
